<compile_context>
chip_gen: v7x
topology: tpu7x:2x2x1
jax: 0.10.0
libtpu: 0.0.40
codegen_flags: <defaults>
</compile_context>

<pallas_src>
import math

import jax
import jax.numpy as jnp
import numpy as np
from jax.experimental import pallas as pl
from jax.experimental.pallas import tpu as pltpu

NEG_INF = float(np.finfo(np.float32).min)


def _make_mha_kernel(return_aw):
    def kernel(klens_ref,                                   # scalar prefetch (SMEM): [B] int32
               key_ref, value_ref, query_ref,               # [1, klen, key_dim], [1, klen, key_dim], [1, tq, query_dim]
               wk_ref, wv_ref, wq_ref,                      # [1, in_dim, d_k]  (bf16, per-head slab; Wq pre-scaled)
               wo_ref,                                      # [1, d_k, key_dim] (bf16, per-head slab)
               bo_ref,                                      # [1, key_dim]      (f32)
               cv_ref,                                      # out: [1, tq, key_dim] (f32, accumulated over heads)
               *rest):                                      # [aw_ref?], k_scr, v_scr
        if return_aw:
            aw_ref, k_scr, v_scr = rest
        else:
            k_scr, v_scr = rest
            aw_ref = None

        b = pl.program_id(0)
        q = pl.program_id(1)
        h = pl.program_id(2)

        bf16 = jnp.bfloat16
        f32 = jnp.float32

        # Per-head K/V projections: computed once per (batch, head) at the first q tile,
        # cached in bf16 VMEM scratch and reused for all remaining q tiles.
        @pl.when(q == 0)
        def _():
            key_bf = key_ref[0].astype(bf16)                  # [klen, key_dim]
            val_bf = value_ref[0].astype(bf16)                # [klen, key_dim]
            k_scr[h] = jnp.dot(key_bf, wk_ref[0],
                               preferred_element_type=f32).astype(bf16)   # [klen, d_k]
            v_scr[h] = jnp.dot(val_bf, wv_ref[0],
                               preferred_element_type=f32).astype(bf16)   # [klen, d_k]

        k_bf = k_scr[h]                                       # [klen, d_k] bf16
        v_bf = v_scr[h]                                       # [klen, d_k] bf16

        # Q projection (1/sqrt(d_k) already folded into wq on the host).
        q_h = jnp.dot(query_ref[0].astype(bf16), wq_ref[0],
                      preferred_element_type=f32)             # [tq, d_k] f32

        # e = (Q / sqrt(d_k)) K^T   -> [tq, klen]
        e = jax.lax.dot_general(
            q_h.astype(bf16), k_bf,
            dimension_numbers=(((1,), (1,)), ((), ())),
            preferred_element_type=f32)

        # Rebuild key-length mask in-register (no dense mask DMA).
        kl = klens_ref[b]
        tq, klen = e.shape
        col = jax.lax.broadcasted_iota(jnp.int32, (tq, klen), 1)
        e = jnp.where(col < kl, e, NEG_INF)

        # Numerically stable softmax over klen (f32).
        e_max = jnp.max(e, axis=-1, keepdims=True)
        p = jnp.exp(e - e_max)
        denom = jnp.sum(p, axis=-1, keepdims=True)
        aw = p * pl.reciprocal(denom, approx=True)
        # TODO(synk): attn_dropout omitted; module default dropout=0 makes it identity.

        if aw_ref is not None:
            aw_ref[0, 0] = aw

        # cv_h = aw @ V_h ; partial output = cv_h @ Wout_h   -> [tq, key_dim]
        cv_h = jnp.dot(aw.astype(bf16), v_bf, preferred_element_type=f32)
        out_partial = jnp.dot(cv_h.astype(bf16), wo_ref[0], preferred_element_type=f32)

        # Accumulate the output projection over the head grid axis.
        @pl.when(h == 0)
        def _():
            cv_ref[0] = out_partial + bo_ref[...]

        @pl.when(h > 0)
        def _():
            cv_ref[0] = cv_ref[0] + out_partial

    return kernel


def multihead_attention_scaled_dot(key, value, query, klens,
                                   w_key, w_value, w_query, w_out, b_out,
                                   n_heads, *, q_tile=None, return_aw=True,
                                   vmem_limit_bytes=None):
    """Pallas wrapper.

    key/value: [B, klen, key_dim], query: [B, qlen, query_dim], klens: [B] int32
    Weights are stored as [in_dim, out_dim] (i.e. W^T of nn.Linear); b_out: [1, key_dim].
    Returns (cv [B, qlen, key_dim] f32, aw [B, n_heads, qlen, klen] f32 or None).
    """
    B, klen, key_dim = key.shape
    qlen, query_dim = query.shape[1], query.shape[2]
    attn_dim = w_key.shape[1]
    assert attn_dim % n_heads == 0
    d_k = attn_dim // n_heads

    # q tiling (grid axis); tile must be the full qlen or a multiple of 8 dividing qlen.
    if q_tile is None or q_tile >= qlen or qlen % q_tile != 0 or q_tile % 8 != 0:
        tq = qlen
    else:
        tq = q_tile
    n_q = qlen // tq

    # Per-head weight slabs, bf16 for the MXU.  1/sqrt(d_k) folded into Wq (free).
    scale = 1.0 / math.sqrt(d_k)
    wk_h = w_key.reshape(key_dim, n_heads, d_k).transpose(1, 0, 2).astype(jnp.bfloat16)
    wv_h = w_value.reshape(key_dim, n_heads, d_k).transpose(1, 0, 2).astype(jnp.bfloat16)
    wq_h = ((w_query * scale).reshape(query_dim, n_heads, d_k)
            .transpose(1, 0, 2).astype(jnp.bfloat16))
    wo_h = w_out.reshape(n_heads, d_k, key_dim).astype(jnp.bfloat16)
    b_out2 = b_out.reshape(1, key_dim).astype(jnp.float32)
    klens = klens.astype(jnp.int32)

    in_specs = [
        pl.BlockSpec((1, klen, key_dim), lambda b, q, h, kl: (b, 0, 0)),     # key   (fetched once per b)
        pl.BlockSpec((1, klen, key_dim), lambda b, q, h, kl: (b, 0, 0)),     # value (fetched once per b)
        pl.BlockSpec((1, tq, query_dim), lambda b, q, h, kl: (b, q, 0)),     # query tile
        pl.BlockSpec((1, key_dim, d_k), lambda b, q, h, kl: (h, 0, 0)),      # Wk[h]
        pl.BlockSpec((1, key_dim, d_k), lambda b, q, h, kl: (h, 0, 0)),      # Wv[h]
        pl.BlockSpec((1, query_dim, d_k), lambda b, q, h, kl: (h, 0, 0)),    # Wq[h] (pre-scaled)
        pl.BlockSpec((1, d_k, key_dim), lambda b, q, h, kl: (h, 0, 0)),      # Wout[h]
        pl.BlockSpec((1, key_dim), lambda b, q, h, kl: (0, 0)),              # b_out
    ]
    out_specs = [
        pl.BlockSpec((1, tq, key_dim), lambda b, q, h, kl: (b, q, 0)),       # cv (resident across h)
    ]
    out_shape = [
        jax.ShapeDtypeStruct((B, qlen, key_dim), jnp.float32),
    ]
    if return_aw:
        out_specs.append(pl.BlockSpec((1, 1, tq, klen), lambda b, q, h, kl: (b, h, q, 0)))
        out_shape.append(jax.ShapeDtypeStruct((B, n_heads, qlen, klen), jnp.float32))

    grid_spec = pltpu.PrefetchScalarGridSpec(
        num_scalar_prefetch=1,
        grid=(B, n_q, n_heads),
        in_specs=in_specs,
        out_specs=out_specs,
        scratch_shapes=[
            pltpu.VMEM((n_heads, klen, d_k), jnp.bfloat16),   # cached K_h projections
            pltpu.VMEM((n_heads, klen, d_k), jnp.bfloat16),   # cached V_h projections
        ],
    )

    outs = pl.pallas_call(
        _make_mha_kernel(return_aw),
        grid_spec=grid_spec,
        out_shape=out_shape,
        compiler_params=pltpu.CompilerParams(
            # q carries the K/V-projection cache, h carries the cv accumulation:
            # both are "arbitrary"; batch stays "parallel" for megacore sharding.
            dimension_semantics=("parallel", "arbitrary", "arbitrary"),
            vmem_limit_bytes=vmem_limit_bytes,
        ),
    )(klens, key, value, query, wk_h, wv_h, wq_h, wo_h, b_out2)

    if return_aw:
        cv, aw = outs
        return cv, aw
    return outs[0], None


def _reference(key, value, query, mask, w_key, w_value, w_query, w_out, b_out, n_heads):
    """Pure-JAX f32 reference mirroring the PyTorch forward."""
    B, klen, key_dim = key.shape
    qlen = query.shape[1]
    attn_dim = w_key.shape[1]
    d_k = attn_dim // n_heads

    def split_heads(x):  # [B, L, attn_dim] -> [B, H, L, d_k]
        return x.reshape(B, -1, n_heads, d_k).transpose(0, 2, 1, 3)

    k = split_heads(key @ w_key)
    v = split_heads(value @ w_value)
    q = split_heads(query @ w_query)
    e = jnp.einsum('bhqd,bhkd->bhqk', q, k) / math.sqrt(d_k)
    e = jnp.where(mask == 0, NEG_INF, e)
    aw = jax.nn.softmax(e, axis=-1)
    cv = jnp.einsum('bhqk,bhkd->bhqd', aw, v)
    cv = cv.transpose(0, 2, 1, 3).reshape(B, qlen, attn_dim)
    cv = cv @ w_out + b_out[0]
    return cv, aw


if __name__ == "__main__":
    B, klen, qlen = 2, 8, 8
    key_dim, query_dim, attn_dim, n_heads = 32, 32, 32, 4

    rng = jax.random.PRNGKey(0)
    ks = jax.random.split(rng, 8)
    key_in = jax.random.normal(ks[0], (B, klen, key_dim), jnp.float32)
    value_in = jax.random.normal(ks[1], (B, klen, key_dim), jnp.float32)
    query_in = jax.random.normal(ks[2], (B, qlen, query_dim), jnp.float32)

    # key lengths (replace the dense mask): batch 0 attends to all 8, batch 1 to 5.
    klens = jnp.array([8, 5], dtype=jnp.int32)

    # deterministic "weights" (stored as [in_dim, out_dim])
    w_key = 0.1 * jax.random.normal(ks[3], (key_dim, attn_dim), jnp.float32)
    w_value = 0.1 * jax.random.normal(ks[4], (key_dim, attn_dim), jnp.float32)
    w_query = 0.1 * jax.random.normal(ks[5], (query_dim, attn_dim), jnp.float32)
    w_out = 0.1 * jax.random.normal(ks[6], (attn_dim, key_dim), jnp.float32)
    b_out = 0.1 * jax.random.normal(ks[7], (1, key_dim), jnp.float32)

    cv, aw = multihead_attention_scaled_dot(
        key_in, value_in, query_in, klens,
        w_key, w_value, w_query, w_out, b_out, n_heads, return_aw=True)
    jax.block_until_ready((cv, aw))

    # f32 reference with the equivalent dense mask rebuilt from klens
    kpos = jnp.arange(klen, dtype=jnp.int32)
    mask = (kpos[None, :] < klens[:, None]).astype(jnp.int32)                # [B, klen]
    mask = jnp.broadcast_to(mask[:, None, None, :], (B, n_heads, qlen, klen))
    cv_ref, aw_ref = _reference(
        key_in, value_in, query_in, mask,
        w_key, w_value, w_query, w_out, b_out, n_heads)

    # bf16 MXU operands + approx reciprocal -> compare with a bf16-appropriate tolerance.
    np.testing.assert_allclose(np.asarray(cv), np.asarray(cv_ref), rtol=2e-2, atol=2e-2)
    np.testing.assert_allclose(np.asarray(aw), np.asarray(aw_ref), rtol=2e-2, atol=2e-2)

    print("KERNEL_OK")
</pallas_src>

<mosaic_0001>
module attributes {stable_mosaic.version = 11 : i64} {
  func.func @kernel(%arg0: i32, %arg1: i32, %arg2: i32, %arg3: memref<2xi32, #tpu.memory_space<smem>>, %arg4: memref<1x8x32xf32, #tpu.memory_space<vmem>>, %arg5: memref<1x8x32xf32, #tpu.memory_space<vmem>>, %arg6: memref<1x8x32xf32, #tpu.memory_space<vmem>>, %arg7: memref<1x32x8xbf16, #tpu.memory_space<vmem>>, %arg8: memref<1x32x8xbf16, #tpu.memory_space<vmem>>, %arg9: memref<1x32x8xbf16, #tpu.memory_space<vmem>>, %arg10: memref<1x8x32xbf16, #tpu.memory_space<vmem>>, %arg11: memref<1x32xf32, #tpu.memory_space<vmem>>, %arg12: memref<1x8x32xf32, #tpu.memory_space<vmem>>, %arg13: memref<1x1x8x8xf32, #tpu.memory_space<vmem>>, %arg14: memref<4x8x8xbf16, #tpu.memory_space<vmem>>, %arg15: memref<4x8x8xbf16, #tpu.memory_space<vmem>>) attributes {dimension_semantics = [#tpu.dimension_semantics<parallel>, #tpu.dimension_semantics<arbitrary>, #tpu.dimension_semantics<arbitrary>], iteration_bounds = array<i64: 2, 1, 4>, scalar_prefetch = 1 : i64, scratch_operands = 2 : i64, tpu.core_type = #tpu.core_type<tc>, window_params = [{transform_indices = @transform_0, window_bounds = array<i64: 1, 8, 32>}, {transform_indices = @transform_1, window_bounds = array<i64: 1, 8, 32>}, {transform_indices = @transform_2, window_bounds = array<i64: 1, 8, 32>}, {transform_indices = @transform_3, window_bounds = array<i64: 1, 32, 8>}, {transform_indices = @transform_4, window_bounds = array<i64: 1, 32, 8>}, {transform_indices = @transform_5, window_bounds = array<i64: 1, 32, 8>}, {transform_indices = @transform_6, window_bounds = array<i64: 1, 8, 32>}, {pipeline_mode = #tpu.pipeline_mode<synchronous>, transform_indices = @transform_7, window_bounds = array<i64: 1, 32>}, {transform_indices = @transform_8, window_bounds = array<i64: 1, 8, 32>}, {transform_indices = @transform_9, window_bounds = array<i64: 1, 1, 8, 8>}]} {
    %c0_i32 = arith.constant 0 : i32
    %0 = arith.cmpi eq, %arg1, %c0_i32 : i32
    %1 = arith.extui %0 : i1 to i32
    %c0_i32_0 = arith.constant 0 : i32
    %2 = arith.cmpi ne, %1, %c0_i32_0 : i32
    scf.if %2 {
      %c0_27 = arith.constant 0 : index
      %c0_28 = arith.constant 0 : index
      %c0_29 = arith.constant 0 : index
      %49 = vector.load %arg4[%c0_27, %c0_28, %c0_29] : memref<1x8x32xf32, #tpu.memory_space<vmem>>, vector<1x8x32xf32>
      %50 = vector.shape_cast %49 : vector<1x8x32xf32> to vector<8x32xf32>
      %51 = arith.truncf %50 : vector<8x32xf32> to vector<8x32xbf16>
      %c0_30 = arith.constant 0 : index
      %c0_31 = arith.constant 0 : index
      %c0_32 = arith.constant 0 : index
      %52 = vector.load %arg5[%c0_30, %c0_31, %c0_32] : memref<1x8x32xf32, #tpu.memory_space<vmem>>, vector<1x8x32xf32>
      %53 = vector.shape_cast %52 : vector<1x8x32xf32> to vector<8x32xf32>
      %54 = arith.truncf %53 : vector<8x32xf32> to vector<8x32xbf16>
      %c0_33 = arith.constant 0 : index
      %c0_34 = arith.constant 0 : index
      %c0_35 = arith.constant 0 : index
      %55 = vector.load %arg7[%c0_33, %c0_34, %c0_35] : memref<1x32x8xbf16, #tpu.memory_space<vmem>>, vector<1x32x8xbf16>
      %56 = vector.shape_cast %55 : vector<1x32x8xbf16> to vector<32x8xbf16>
      %cst_36 = arith.constant dense<0.000000e+00> : vector<8x8xf32>
      %57 = tpu.matmul %51, %56, %cst_36 {dimension_numbers = #tpu.dot_dimension_numbers<[1], [0], [0], [1], [0, 0, 1, 1], [], []>} : vector<8x32xbf16>, vector<32x8xbf16>, vector<8x8xf32> -> vector<8x8xf32>
      %58 = arith.truncf %57 : vector<8x8xf32> to vector<8x8xbf16>
      %59 = arith.index_cast %arg2 : i32 to index
      %c0_37 = arith.constant 0 : index
      %c0_38 = arith.constant 0 : index
      %60 = vector.load %arg14[%59, %c0_37, %c0_38] : memref<4x8x8xbf16, #tpu.memory_space<vmem>>, vector<1x8x8xbf16>
      %61 = vector.shape_cast %60 : vector<1x8x8xbf16> to vector<8x8xbf16>
      %62 = vector.shape_cast %58 : vector<8x8xbf16> to vector<1x8x8xbf16>
      tpu.vector_store %arg14[%59, %c0_37, %c0_38], %62 {strides = array<i32>} : memref<4x8x8xbf16, #tpu.memory_space<vmem>>, vector<1x8x8xbf16>,
      %c0_39 = arith.constant 0 : index
      %c0_40 = arith.constant 0 : index
      %c0_41 = arith.constant 0 : index
      %63 = vector.load %arg8[%c0_39, %c0_40, %c0_41] : memref<1x32x8xbf16, #tpu.memory_space<vmem>>, vector<1x32x8xbf16>
      %64 = vector.shape_cast %63 : vector<1x32x8xbf16> to vector<32x8xbf16>
      %cst_42 = arith.constant dense<0.000000e+00> : vector<8x8xf32>
      %65 = tpu.matmul %54, %64, %cst_42 {dimension_numbers = #tpu.dot_dimension_numbers<[1], [0], [0], [1], [0, 0, 1, 1], [], []>} : vector<8x32xbf16>, vector<32x8xbf16>, vector<8x8xf32> -> vector<8x8xf32>
      %66 = arith.truncf %65 : vector<8x8xf32> to vector<8x8xbf16>
      %67 = arith.index_cast %arg2 : i32 to index
      %c0_43 = arith.constant 0 : index
      %c0_44 = arith.constant 0 : index
      %68 = vector.load %arg15[%67, %c0_43, %c0_44] : memref<4x8x8xbf16, #tpu.memory_space<vmem>>, vector<1x8x8xbf16>
      %69 = vector.shape_cast %68 : vector<1x8x8xbf16> to vector<8x8xbf16>
      %70 = vector.shape_cast %66 : vector<8x8xbf16> to vector<1x8x8xbf16>
      tpu.vector_store %arg15[%67, %c0_43, %c0_44], %70 {strides = array<i32>} : memref<4x8x8xbf16, #tpu.memory_space<vmem>>, vector<1x8x8xbf16>,
    } else {
    }
    %3 = arith.index_cast %arg2 : i32 to index
    %c0 = arith.constant 0 : index
    %c0_1 = arith.constant 0 : index
    %4 = vector.load %arg14[%3, %c0, %c0_1] : memref<4x8x8xbf16, #tpu.memory_space<vmem>>, vector<1x8x8xbf16>
    %5 = vector.shape_cast %4 : vector<1x8x8xbf16> to vector<8x8xbf16>
    %6 = arith.index_cast %arg2 : i32 to index
    %c0_2 = arith.constant 0 : index
    %c0_3 = arith.constant 0 : index
    %7 = vector.load %arg15[%6, %c0_2, %c0_3] : memref<4x8x8xbf16, #tpu.memory_space<vmem>>, vector<1x8x8xbf16>
    %8 = vector.shape_cast %7 : vector<1x8x8xbf16> to vector<8x8xbf16>
    %c0_4 = arith.constant 0 : index
    %c0_5 = arith.constant 0 : index
    %c0_6 = arith.constant 0 : index
    %9 = vector.load %arg6[%c0_4, %c0_5, %c0_6] : memref<1x8x32xf32, #tpu.memory_space<vmem>>, vector<1x8x32xf32>
    %10 = vector.shape_cast %9 : vector<1x8x32xf32> to vector<8x32xf32>
    %11 = arith.truncf %10 : vector<8x32xf32> to vector<8x32xbf16>
    %c0_7 = arith.constant 0 : index
    %c0_8 = arith.constant 0 : index
    %c0_9 = arith.constant 0 : index
    %12 = vector.load %arg9[%c0_7, %c0_8, %c0_9] : memref<1x32x8xbf16, #tpu.memory_space<vmem>>, vector<1x32x8xbf16>
    %13 = vector.shape_cast %12 : vector<1x32x8xbf16> to vector<32x8xbf16>
    %cst = arith.constant dense<0.000000e+00> : vector<8x8xf32>
    %14 = tpu.matmul %11, %13, %cst {dimension_numbers = #tpu.dot_dimension_numbers<[1], [0], [0], [1], [0, 0, 1, 1], [], []>} : vector<8x32xbf16>, vector<32x8xbf16>, vector<8x8xf32> -> vector<8x8xf32>
    %15 = arith.truncf %14 : vector<8x8xf32> to vector<8x8xbf16>
    %cst_10 = arith.constant dense<0.000000e+00> : vector<8x8xf32>
    %16 = tpu.matmul %15, %5, %cst_10 {dimension_numbers = #tpu.dot_dimension_numbers<[1], [1], [0], [0], [0, 0, 1, 0], [], []>} : vector<8x8xbf16>, vector<8x8xbf16>, vector<8x8xf32> -> vector<8x8xf32>
    %17 = arith.index_cast %arg0 : i32 to index
    %18 = memref.load %arg3[%17] : memref<2xi32, #tpu.memory_space<smem>>
    %19 = tpu.iota {dimensions = array<i32: 1>} : vector<8x8xi32>
    %20 = vector.broadcast %18 : i32 to vector<8x8xi32>
    %21 = arith.cmpi slt, %19, %20 : vector<8x8xi32>
    %cst_11 = arith.constant -3.40282347E+38 : f32
    %22 = vector.broadcast %cst_11 : f32 to vector<8x8xf32>
    %23 = arith.select %21, %16, %22 : vector<8x8xi1>, vector<8x8xf32>
    %cst_12 = arith.constant dense<0xFF800000> : vector<8xf32>
    %24 = vector.multi_reduction <maximumf>, %23, %cst_12 [1] : vector<8x8xf32> to vector<8xf32>
    %25 = vector.shape_cast %24 : vector<8xf32> to vector<8x1xf32>
    %26 = vector.broadcast %25 : vector<8x1xf32> to vector<8x8xf32>
    %27 = arith.subf %23, %26 : vector<8x8xf32>
    %28 = math.exp %27 : vector<8x8xf32>
    %cst_13 = arith.constant dense<0.000000e+00> : vector<8xf32>
    %29 = vector.multi_reduction <add>, %28, %cst_13 [1] : vector<8x8xf32> to vector<8xf32>
    %30 = vector.shape_cast %29 : vector<8xf32> to vector<8x1xf32>
    %31 = tpu.reciprocal %30 {approx = true} : vector<8x1xf32> -> vector<8x1xf32>
    %32 = vector.broadcast %31 : vector<8x1xf32> to vector<8x8xf32>
    %33 = arith.mulf %28, %32 : vector<8x8xf32>
    %c0_14 = arith.constant 0 : index
    %c0_15 = arith.constant 0 : index
    %c0_16 = arith.constant 0 : index
    %c0_17 = arith.constant 0 : index
    %34 = vector.load %arg13[%c0_14, %c0_15, %c0_16, %c0_17] : memref<1x1x8x8xf32, #tpu.memory_space<vmem>>, vector<1x1x8x8xf32>
    %35 = vector.shape_cast %34 : vector<1x1x8x8xf32> to vector<8x8xf32>
    %36 = vector.shape_cast %33 : vector<8x8xf32> to vector<1x1x8x8xf32>
    tpu.vector_store %arg13[%c0_14, %c0_15, %c0_16, %c0_17], %36 {strides = array<i32>} : memref<1x1x8x8xf32, #tpu.memory_space<vmem>>, vector<1x1x8x8xf32>,
    %37 = arith.truncf %33 : vector<8x8xf32> to vector<8x8xbf16>
    %cst_18 = arith.constant dense<0.000000e+00> : vector<8x8xf32>
    %38 = tpu.matmul %37, %8, %cst_18 {dimension_numbers = #tpu.dot_dimension_numbers<[1], [0], [0], [1], [0, 0, 1, 1], [], []>} : vector<8x8xbf16>, vector<8x8xbf16>, vector<8x8xf32> -> vector<8x8xf32>
    %39 = arith.truncf %38 : vector<8x8xf32> to vector<8x8xbf16>
    %c0_19 = arith.constant 0 : index
    %c0_20 = arith.constant 0 : index
    %c0_21 = arith.constant 0 : index
    %40 = vector.load %arg10[%c0_19, %c0_20, %c0_21] : memref<1x8x32xbf16, #tpu.memory_space<vmem>>, vector<1x8x32xbf16>
    %41 = vector.shape_cast %40 : vector<1x8x32xbf16> to vector<8x32xbf16>
    %cst_22 = arith.constant dense<0.000000e+00> : vector<8x32xf32>
    %42 = tpu.matmul %39, %41, %cst_22 {dimension_numbers = #tpu.dot_dimension_numbers<[1], [0], [0], [1], [0, 0, 1, 1], [], []>} : vector<8x8xbf16>, vector<8x32xbf16>, vector<8x32xf32> -> vector<8x32xf32>
    %c0_i32_23 = arith.constant 0 : i32
    %43 = arith.cmpi eq, %arg2, %c0_i32_23 : i32
    %44 = arith.extui %43 : i1 to i32
    %c0_i32_24 = arith.constant 0 : i32
    %45 = arith.cmpi ne, %44, %c0_i32_24 : i32
    scf.if %45 {
      %c0_27 = arith.constant 0 : index
      %c0_28 = arith.constant 0 : index
      %49 = vector.load %arg11[%c0_27, %c0_28] : memref<1x32xf32, #tpu.memory_space<vmem>>, vector<1x32xf32>
      %50 = vector.broadcast %49 : vector<1x32xf32> to vector<8x32xf32>
      %51 = arith.addf %42, %50 : vector<8x32xf32>
      %c0_29 = arith.constant 0 : index
      %c0_30 = arith.constant 0 : index
      %c0_31 = arith.constant 0 : index
      %52 = vector.load %arg12[%c0_29, %c0_30, %c0_31] : memref<1x8x32xf32, #tpu.memory_space<vmem>>, vector<1x8x32xf32>
      %53 = vector.shape_cast %52 : vector<1x8x32xf32> to vector<8x32xf32>
      %54 = vector.shape_cast %51 : vector<8x32xf32> to vector<1x8x32xf32>
      tpu.vector_store %arg12[%c0_29, %c0_30, %c0_31], %54 {strides = array<i32>} : memref<1x8x32xf32, #tpu.memory_space<vmem>>, vector<1x8x32xf32>,
    } else {
    }
    %c0_i32_25 = arith.constant 0 : i32
    %46 = arith.cmpi sgt, %arg2, %c0_i32_25 : i32
    %47 = arith.extui %46 : i1 to i32
    %c0_i32_26 = arith.constant 0 : i32
    %48 = arith.cmpi ne, %47, %c0_i32_26 : i32
    scf.if %48 {
      %c0_27 = arith.constant 0 : index
      %c0_28 = arith.constant 0 : index
      %c0_29 = arith.constant 0 : index
      %49 = vector.load %arg12[%c0_27, %c0_28, %c0_29] : memref<1x8x32xf32, #tpu.memory_space<vmem>>, vector<1x8x32xf32>
      %50 = vector.shape_cast %49 : vector<1x8x32xf32> to vector<8x32xf32>
      %51 = arith.addf %50, %42 : vector<8x32xf32>
      %c0_30 = arith.constant 0 : index
      %c0_31 = arith.constant 0 : index
      %c0_32 = arith.constant 0 : index
      %52 = vector.load %arg12[%c0_30, %c0_31, %c0_32] : memref<1x8x32xf32, #tpu.memory_space<vmem>>, vector<1x8x32xf32>
      %53 = vector.shape_cast %52 : vector<1x8x32xf32> to vector<8x32xf32>
      %54 = vector.shape_cast %51 : vector<8x32xf32> to vector<1x8x32xf32>
      tpu.vector_store %arg12[%c0_30, %c0_31, %c0_32], %54 {strides = array<i32>} : memref<1x8x32xf32, #tpu.memory_space<vmem>>, vector<1x8x32xf32>,
    } else {
    }
    return
  }
  func.func @transform_0(%arg0: i32, %arg1: i32, %arg2: i32, %arg3: memref<2xi32, #tpu.memory_space<smem>>) -> (i32, i32, i32) {
    %c0_i32 = arith.constant 0 : i32
    %c0_i32_0 = arith.constant 0 : i32
    %c0_i32_1 = arith.constant 0 : i32
    return %arg0, %c0_i32, %c0_i32_0 : i32, i32, i32
  }
  func.func @transform_1(%arg0: i32, %arg1: i32, %arg2: i32, %arg3: memref<2xi32, #tpu.memory_space<smem>>) -> (i32, i32, i32) {
    %c0_i32 = arith.constant 0 : i32
    %c0_i32_0 = arith.constant 0 : i32
    %c0_i32_1 = arith.constant 0 : i32
    return %arg0, %c0_i32, %c0_i32_0 : i32, i32, i32
  }
  func.func @transform_2(%arg0: i32, %arg1: i32, %arg2: i32, %arg3: memref<2xi32, #tpu.memory_space<smem>>) -> (i32, i32, i32) {
    %c0_i32 = arith.constant 0 : i32
    %c0_i32_0 = arith.constant 0 : i32
    return %arg0, %arg1, %c0_i32 : i32, i32, i32
  }
  func.func @transform_3(%arg0: i32, %arg1: i32, %arg2: i32, %arg3: memref<2xi32, #tpu.memory_space<smem>>) -> (i32, i32, i32) {
    %c0_i32 = arith.constant 0 : i32
    %c0_i32_0 = arith.constant 0 : i32
    %c0_i32_1 = arith.constant 0 : i32
    return %arg2, %c0_i32, %c0_i32_0 : i32, i32, i32
  }
  func.func @transform_4(%arg0: i32, %arg1: i32, %arg2: i32, %arg3: memref<2xi32, #tpu.memory_space<smem>>) -> (i32, i32, i32) {
    %c0_i32 = arith.constant 0 : i32
    %c0_i32_0 = arith.constant 0 : i32
    %c0_i32_1 = arith.constant 0 : i32
    return %arg2, %c0_i32, %c0_i32_0 : i32, i32, i32
  }
  func.func @transform_5(%arg0: i32, %arg1: i32, %arg2: i32, %arg3: memref<2xi32, #tpu.memory_space<smem>>) -> (i32, i32, i32) {
    %c0_i32 = arith.constant 0 : i32
    %c0_i32_0 = arith.constant 0 : i32
    %c0_i32_1 = arith.constant 0 : i32
    return %arg2, %c0_i32, %c0_i32_0 : i32, i32, i32
  }
  func.func @transform_6(%arg0: i32, %arg1: i32, %arg2: i32, %arg3: memref<2xi32, #tpu.memory_space<smem>>) -> (i32, i32, i32) {
    %c0_i32 = arith.constant 0 : i32
    %c0_i32_0 = arith.constant 0 : i32
    %c0_i32_1 = arith.constant 0 : i32
    return %arg2, %c0_i32, %c0_i32_0 : i32, i32, i32
  }
  func.func @transform_7(%arg0: i32, %arg1: i32, %arg2: i32, %arg3: memref<2xi32, #tpu.memory_space<smem>>) -> (i32, i32) {
    %c0_i32 = arith.constant 0 : i32
    %c0_i32_0 = arith.constant 0 : i32
    %c0_i32_1 = arith.constant 0 : i32
    return %c0_i32, %c0_i32_0 : i32, i32
  }
  func.func @transform_8(%arg0: i32, %arg1: i32, %arg2: i32, %arg3: memref<2xi32, #tpu.memory_space<smem>>) -> (i32, i32, i32) {
    %c0_i32 = arith.constant 0 : i32
    %c0_i32_0 = arith.constant 0 : i32
    return %arg0, %arg1, %c0_i32 : i32, i32, i32
  }
  func.func @transform_9(%arg0: i32, %arg1: i32, %arg2: i32, %arg3: memref<2xi32, #tpu.memory_space<smem>>) -> (i32, i32, i32, i32) {
    %c0_i32 = arith.constant 0 : i32
    %c0_i32_0 = arith.constant 0 : i32
    return %arg0, %arg2, %arg1, %c0_i32 : i32, i32, i32, i32
  }
}

</mosaic_0001>

<bundles_post_ra>
// kernel: tpu_custom_call.1
= control target key start
LH: loop header
LB: loop body
LE: loop exit
PB: predicated region body
PF: predicated region fallthrough
CT: control target
= control target key end

     0   :  { %s1855_s0 = inlined_call_operand.vmem [shape: s32[2], index: 0, kind: input, shape index: {}]   ;;  %s1856_s1 = inlined_call_operand.vmem [shape: f32[2,8,32], index: 1, kind: input, shape index: {}]   ;;  %s1857_s2 = inlined_call_operand.vmem [shape: f32[2,8,32], index: 2, kind: input, shape index: {}]   ;;  %s1858_s3 = inlined_call_operand.vmem [shape: f32[2,8,32], index: 3, kind: input, shape index: {}]   ;;  %s1859_s4 = inlined_call_operand.vmem [shape: bf16[4,32,8], index: 4, kind: input, shape index: {}]   ;;  %s1860_s5 = inlined_call_operand.vmem [shape: bf16[4,32,8], index: 5, kind: input, shape index: {}]   ;;  %s1861_s6 = inlined_call_operand.vmem [shape: bf16[4,32,8], index: 6, kind: input, shape index: {}]   ;;  %s1862_s7 = inlined_call_operand.vmem [shape: bf16[4,8,32], index: 7, kind: input, shape index: {}]   ;;  %s1863_s8 = inlined_call_operand.vmem [shape: f32[1,32], index: 8, kind: input, shape index: {}]   ;;  %s1864_s9 = inlined_call_operand.hbm [shape: f32[2,8,32], index: 9, kind: output, shape index: {0}]   ;;  %s1865_s10 = inlined_call_operand.hbm [shape: f32[2,4,8,8], index: 10, kind: output, shape index: {1}]  }
   0x1   :  { %1879 = sst [smem:[#allocation25_spill]] %s1864_s9  ;;  %s16_s15 = sshll.u32 %s1855_s0, 4  ;;  %s17_s15 = int_to_ptr.vmem [resolvable:$true] %s16_s15 }
   0x2   :  { %1880 = sst [smem:[#allocation26_spill]] %s1865_s10  ;;  %s1324_s16 = scalar_lea.vmem %s17_s15, 16 }
   0x3   :  { %p1325_p0 = scmp.ne.s32.totalorder %s17_s15, %s1324_s16  ;;  %p1329_p1 = scmp.lt.s32.totalorder %s17_s15, %s17_s15 }
   0x4   :  { %p1330_p2 = scmp.lt.s32.totalorder %s1324_s16, %s1324_s16 }
   0x6   :  { %p1331_p3 = por %p1330_p2, %p1329_p1 }
   0x8   :  { %p1332_p4 = pnand %p1331_p3, %p1325_p0 }
   0xa   :  { %1335 = shalt.err (!%p1332_p4)  }
   0xb   :  { %s1490_s17 = smov [#allocation5]  }
   0xc   :  { %19 = dma.vmem_to_smem %s17_s15, 16, %s1490_s17, [#allocation4] }
   0xd   :  { %1436 = dma.done.wait [#allocation4], 16 }
   0xe   :  { %1437 = vsyncadd [#allocation4], 4294967280 }
   0xf   :  { %21 = sfence }
  0x10   :  { %22 = vsyncpa [#allocation7], 0 }
  0x11   :  { %24 = vsyncpa [#allocation7 + $0x1], 0 }
  0x12   :  { %25 = vsyncpa [#allocation9], 0 }
  0x13   :  { %27 = vsyncpa [#allocation9 + $0x1], 0  ;;  %s1553_s18 = smov 0   ;;  %s1555_s0 = smov 0  }
  0x14   :  { %s1557_s19 = smov 0   ;;  %s1559_s20 = smov 0  }
  0x15   :  { %s1561_s21 = smov 0   ;;  %s1563_s22 = smov 0  }
  0x16   :  { %s1565_s23 = smov 0   ;;  %s1567_s24 = smov 0  }
  0x17   :  { %s1569_s25 = smov 0   ;;  %s1571_s26 = smov 0  }
  0x18   :  { %s1573_s27 = smov 0  }
  0x19 LB: > { %1881 = sst [smem:[#allocation13_spill]] %s1448_s18  ;;  %s1108_s28 = sadd.s32 4294967295, %s1488_s27   ;;  %s1488_s27 = sphi %s1573_s27, %s33_s27   ;;  %s1484_s26 = sphi %s1571_s26, %s1914_s26   ;;  %s1480_s25 = sphi %s1569_s25, %s1913_s25   ;;  %s1476_s24 = sphi %s1567_s24, %s1912_s24   ;;  %s1472_s23 = sphi %s1565_s23, %s1911_s23   ;;  %s1468_s22 = sphi %s1563_s22, %s1910_s22   ;;  %s1464_s21 = sphi %s1561_s21, %s1918_s21   ;;  %s1460_s20 = sphi %s1559_s20, %s1917_s20   ;;  %s1456_s19 = sphi %s1557_s19, %s1908_s19   ;;  %s1452_s0 = sphi %s1555_s0, %s1916_s0   ;;  %s1448_s18 = sphi %s1553_s18, %s1915_s18  }
  0x1a   : > { %1882 = sst [smem:[#allocation14_spill]] %s1456_s19  ;;  %s1109_s29 = sadd.s32 4294967294, %s1488_s27  }
  0x1b   : > { %1883 = sst [smem:[#allocation15_spill]] %s1460_s20  ;;  %s45_s30 = sadd.s32 1, %s1480_s25 }
  0x1c   : > { %1884 = sst [smem:[#allocation16_spill]] %s1468_s22  ;;  %s52_s11 = sadd.s32 1, %s1484_s26 }
  0x1d   : > { %1885 = sst [smem:[#allocation17_spill]] %s1480_s25  ;;  %p46_p5 = scmp.ge.s32.totalorder %s45_s30, 4 }
  0x1e   : > { %1886 = sst [smem:[#allocation18_spill]] %s1484_s26  ;;  %s266_s12 = sadd.s32 1, %s1468_s22 }
  0x1f   : > { %p276_p6 = scmp.ne.s32.totalorder %s1468_s22, %s1464_s21  ;;  %p1615_p7 = scmp.eq.s32.totalorder %s1108_s28, 7 }
  0x20   : > { %s1920_s30 = smov (%p46_p5, %s45_s30), 0  ;;  %s1922_s11 = smov (!%p46_p5, %s52_s11), %s1484_s26 }
  0x21   : > { %1888 = sst [smem:[#allocation19_spill]] %s1920_s30  ;;  %p1624_p8 = por %p1615_p7, %p276_p6 }
  0x22   : > { %p282_p9 = scmp.ne.s32.totalorder %s1464_s21, %s1460_s20  ;;  %p54_p10 = scmp.ge.s32.totalorder %s1922_s11, 2 }
  0x23   : > { %p1630_p11 = scmp.eq.s32.totalorder %s1109_s29, 7  ;;  %s290_s16 = ssub.s32 %s1480_s25, %s1920_s30 }
  0x24   : > { %s296_s17 = sadd.s32 1, %s1456_s19  ;;  %s1924_s11 = smov (%p54_p10, %s1922_s11), 0 }
  0x25   : > { %1891 = sst [smem:[#allocation20_spill]] %s1924_s11  ;;  %p1641_p12 = por %p1630_p11, %p282_p9 }
  0x26   : > { %p306_p13 = scmp.ne.s32.totalorder %s1456_s19, %s1452_s0  ;;  %s261_s20 = ssub.s32 %s1484_s26, %s1924_s11 }
  0x27   : > { %s1892_s28 = scalar_select %p1641_p12, 1, 0 }
  0x28   : > { %p312_p0 = scmp.ne.s32.totalorder %s1452_s0, %s1448_s18  ;;  %p264_p1 = scmp.eq.s32.totalorder %s261_s20, 0 }
  0x29   : > { %1893 = sst [smem:[#allocation21_spill]] %s1892_s28  ;;  %s291_s29 = sor.u32 %s290_s16, %s261_s20 }
  0x2a   : > { %p294_p2 = scmp.eq.s32.totalorder %s291_s29, 0  ;;  %p1653_p3 = por %p306_p13, %p1615_p7 }
  0x2b   : > { %s1658_s30 = scalar_select %p264_p1, %s1468_s22, %s266_s12  }
  0x2c   : > { %s1661_s25 = scalar_select %p294_p2, %s1456_s19, %s296_s17  }
  0x2d   : > { %1895 = sst [smem:[#allocation22_spill]] %s1658_s30  ;;  %p1665_p4 = por %p312_p0, %p1630_p11 }
  0x2e   : > { %1896 = sst [smem:[#allocation23_spill]] %s1661_s25  ;;  %p1112_p5 = scmp.ge.s32.totalorder %s1488_s27, 1 }
  0x2f   : > { %s1897_s9 = scalar_select %p1665_p4, 1, 0 }
  0x30   : > { %p389_p6 = scmp.lt.s32.totalorder %s1488_s27, 9 }
  0x31   : > { %1898 = sst [smem:[#allocation24_spill]] %s1897_s9 }
  0x32   : > { %p390_p9 = pnand %p1112_p5, %p389_p6 }
  0x33   : > { %s1871_s20 = sand.u32 (!%p390_p9), 1, %s1464_s21   ;;  %p474_p7 = scmp.lt.s32.totalorder (!%p390_p9), %s1472_s23, 3  ;;  %v1491_v0 = vmov (!%p390_p9), 0.0   ;;  %vm1492_vm0 = vmmov (!%p390_p9), 0   ;;  %vm518_vm1 = vcmask (!%p390_p9), 261120   ;;  %vm565_vm2 = vcmask (!%p390_p9), 60416  }
  0x34   : > { %393 = sbr.rel (%p390_p9) target bundleno = 1320 (0x528), region = 52  ;;  %s1675_s12 = sshll.u32 (!%p390_p9), %s1871_s20, 3  ;;  %1169 = vmatprep.subr.bf16.mxu0 (!%p390_p9), %v1491_v0  ;;  %1173 = vmatprep.mubr.msk.bf16.mxu0 (!%p390_p9), %vm1492_vm0, %v1491_v0  ;;  %vm699_vm3 = vcmask (!%p390_p9), 64512   ;;  %vm768_vm4 = vcmask (!%p390_p9), 1043456   ;;  %v747_v32 = vlaneseq (!%p390_p9) }
  0x35   : > { %p459_p10 = scmp.lt.s32.totalorder (!%p390_p9), %s1476_s24, 1  ;;  %1177 = vmatprep.subr.bf16.mxu1 (!%p390_p9), %v1491_v0  ;;  %1181 = vmatprep.mubr.msk.bf16.mxu1 (!%p390_p9), %vm1492_vm0, %v1491_v0  ;;  %s1128_s25 = sshll.u32 (!%p390_p9), %s1472_s23, 2 }
  0x36   : > { %s564_s28 = scalar_lea.vmem (!%p390_p9), [#allocation2], %s1128_s25  ;;  %v748_v33 = vand.u32 (!%p390_p9), 127, %v747_v32  ;;  %s456_s26 = sand.u32 (!%p390_p9), 1, %s1452_s0  }
  0x37   : > { %s1747_s30 = sshll.u32 (!%p390_p9), %s456_s26, 3  ;;  %p1141_p11 = scmp.ne.s32.totalorder (!%p390_p9), %s1472_s23, 0 }
  0x3b   : > { %s1685_s13 = scalar_select %p474_p7, %s1472_s23, 3 }
  0x3c   : > { %s460_s15 = scalar_select %p459_p10, %s1476_s24, 1 }
  0x3d   : > { %s1151_s16 = sshll.u32 %s1685_s13, 4  ;;  %v1142_v61 = vld [vmem:[%s1863_s8] ss:$0 sm:$0xff] (!%p1141_p11) }
  0x3e   : > { %s478_s20 = scalar_lea.vmem %s1859_s4, %s1151_s16  ;;  %s1692_s11 = sshll.u32 %s460_s15, 3 }
  0x3f   : > { %v1314_v1 = vld [vmem:[%s478_s20] sm:$0xff]   ;;  %s488_s22 = scalar_lea.vmem %s1861_s6, %s1151_s16  ;;  %v1315_v2 = vld [vmem:[%s478_s20 + $0x8] sm:$0xff]   ;;  %s462_s9 = scalar_lea.vmem %s1856_s1, %s1692_s11 }
  0x40   : > { %1170 = vmatpush3.bf16.msra.mxu0 %v1314_v1  ;;  %v498_v3 = vld [vmem:[%s462_s9] sm:$0xff]  ;;  %s483_s17 = scalar_lea.vmem %s1860_s5, %s1151_s16  ;;  %s473_s19 = scalar_lea.vmem %s1858_s3, %s1692_s11  ;;  %v1317_v7 = vld [vmem:[%s488_s22 + $0x8] sm:$0xff]  }
  0x41   : > { %1171 = vmatprep.subr.bf16.mxu0 %v1491_v0  ;;  %v499_v4 = vpack.c.bf16 %v498_v3, %v498_v3  ;;  %v1318_v5 = vld [vmem:[%s483_s17] sm:$0xff]   ;;  %v1319_v10 = vld [vmem:[%s483_s17 + $0x8] sm:$0xff]   ;;  %s746_s20 = sld [smem:[#allocation5 + %s1476_s24]]  ;;  %s1124_s15 = sshll.u32 %s1685_s13, 2 }
  0x42   : > { %v1316_v6 = vld [vmem:[%s488_s22] sm:$0xff]   ;;  %1178 = vmatpush3.bf16.msra.mxu1 %v1318_v5  ;;  %s466_s22 = scalar_lea.vmem %s1857_s2, %s1692_s11  ;;  %s628_s11 = scalar_lea.vmem [#allocation3], %s1128_s25 }
  0x43   : > { %1179 = vmatprep.subr.bf16.mxu1 %v1491_v0  ;;  %v636_v8 = vld [vmem:[%s473_s19] sm:$0xff]  ;;  %s492_s17 = scalar_lea.vmem %s1862_s7, %s1124_s15  ;;  %s458_s13 = scalar_lea.vmem [#allocation8], %s1747_s30 }
  0x44   : > { %1172 = vmatpush3.bf16.msra.mxu0 %v1315_v2  ;;  %v637_v9 = vpack.c.bf16 %v636_v8, %v636_v8  ;;  %v500_v11 = vld [vmem:[%s466_s22] sm:$0xff]  ;;  %s451_s19 = scalar_lea.vmem [#allocation6], %s1675_s12 }
  0x45   : > { %1185 = vmatprep.subr.bf16.mxu0 %v1491_v0  ;;  %v501_v12 = vpack.c.bf16 %v500_v11, %v500_v11  ;;  %v813_v46 = vld [vmem:[%s492_s17] sm:$0xf] }
  0x46   : > { %1180 = vmatpush3.bf16.msra.mxu1 %v1319_v10  ;;  %v818_v47 = vsel %vm768_vm4, %v813_v46, 0 }
  0x47   : > { %1174 = vmatmul.mubr.msk.bf16.vlgmr.msra.gmra.mrb[0].mxu0 %vm518_vm1, %v499_v4  ;;  %1193 = vmatprep.subr.bf16.mxu1 %v1491_v0  ;;  %v749_v34 = vstv %s746_s20 }
  0x48   : > { %1186 = vmatpush3.bf16.msra.mxu0 %v1316_v6  ;;  %1189 = vmatprep.mubr.msk.bf16.mxu0 %vm1492_vm0, %v1491_v0  ;;  %vm750_vm5 = vcmp.lt.s32.totalorder %v748_v33, %v749_v34 }
  0x49   : > { %1187 = vmatprep.subr.bf16.mxu0 %v1491_v0  ;;  %1182 = vmatmul.mubr.msk.bf16.vlgmr.msra.gmra.mrb[0].mxu1 %vm518_vm1, %v501_v12 }
  0x4a   : > { %1195 = vmatprep.mubr.msk.bf16.mxu1 %vm1492_vm0, %v1491_v0 }
  0x4c   : > { %1188 = vmatpush3.bf16.msra.mxu0 %v1317_v7 }
  0x4d   : > { %1199 = vmatprep.subr.bf16.mxu0 %v1491_v0 }
  0x4f   : > { %1190 = vmatmul.mubr.msk.bf16.vlgmr.msra.gmra.mrb[4].mxu0 %vm518_vm1, %v637_v9 }
  0x50   : > { %1201 = vmatprep.mubr.msk.bf16.mxu0 %vm1492_vm0, %v1491_v0 }
 0x11a   : > { %v556_v13 = vpop.f32.mrb[0].mxu0 }
 0x11b   : > { %v562_v14 = vpack.c.bf16 %v556_v13, %v556_v13  ;;  %v1175_v15 = vpop.f32.mrb[1].mxu0 }
 0x11c   : > { %v559_v16 = vpop.f32.mrb[2].mxu0  ;;  %v620_v25 = vpop.f32.mrb[0].mxu1 }
 0x11d   : > { %566 = vst.msk [vmem:[%s564_s28] sm:$0xf] %vm565_vm2, %v562_v14  ;;  %v1176_v17 = vpop.f32.mrb[3].mxu0  ;;  %v626_v26 = vpack.c.bf16 %v620_v25, %v620_v25  ;;  %v1183_v27 = vpop.f32.mrb[1].mxu1 }
 0x11e   : > { %v623_v28 = vpop.f32.mrb[2].mxu1 }
 0x11f   : > { %629 = vst.msk [vmem:[%s628_s11] sm:$0xf] %vm565_vm2, %v626_v26  ;;  %v1184_v29 = vpop.f32.mrb[3].mxu1 }
 0x122   : > { %v692_v18 = vpop.f32.mrb[4].mxu0 }
 0x123   : > { %v1191_v19 = vpop.f32.mrb[5].mxu0  ;;  %v698_v24 = vpack.c.bf16 %v692_v18, %v692_v18 }
 0x124   : > { %v632_v20 = vld [vmem:[%s564_s28] sm:$0xf]  ;;  %v695_v21 = vpop.f32.mrb[6].mxu0 }
 0x125   : > { %v704_v22 = vsel %vm699_vm3, %v632_v20, 0  ;;  %v1192_v23 = vpop.f32.mrb[7].mxu0 }
 0x126   : > { %1194 = vmatpush3.bf16.xpose.msra.mxu1 %v704_v22  ;;  %v635_v30 = vld [vmem:[%s628_s11] sm:$0xf] }
 0x127   : > { %1205 = vmatprep.subr.bf16.mxu1 %v1491_v0  ;;  %v770_v31 = vsel %vm768_vm4, %v635_v30, 0 }
 0x128   : > { %1200 = vmatpush3.bf16.msra.mxu0 %v770_v31 }
 0x12d   : > { %1196 = vmatmul.mubr.msk.bf16.vlgmr.msra.gmra.mrb[4].mxu1 %vm699_vm3, %v698_v24 }
 0x12e   : > { %1207 = vmatprep.mubr.msk.bf16.mxu1 %vm1492_vm0, %v1491_v0  ;;  %1206 = vmatpush3.bf16.msra.mxu1 %v818_v47 }
 0x200   : > { %v740_v35 = vpop.f32.mrb[4].mxu1 }
 0x201   : > { %v751_v36 = vsel %vm750_vm5, %v740_v35, -3.4028235e+38  ;;  %v1197_v37 = vpop.f32.mrb[5].mxu1 }
 0x202   : > { %v743_v38 = vpop.f32.mrb[6].mxu1  ;;  %v752_v39 = vsel %vm699_vm3, %v751_v36, -inf }
 0x203   : > { %753 = vmax.xlane.f32.xlu0 %v752_v39  ;;  %v1198_v40 = vpop.f32.mrb[7].mxu1 }
 0x290   : > { %v754_v41 = vpop.xlane.xlu0 %753 }
 0x291   : > { %v755_v42 = vsub.f32 %v751_v36, %v754_v41 }
 0x293   : > { %v756_v43 = vmul.f32 1.442695, %v755_v42 }
 0x295   : > { %1320 = vpow2.f32 %v756_v43 }
 0x29f   : > { %v1321_v44 = vpop.eup %1320 }
 0x2a0   : > { %v758_v45 = vsel %vm699_vm3, %v1321_v44, 0.0 }
 0x2a1   : > { %759 = vadd.xlane.f32.xlu0 %v758_v45 }
 0x32e   : > { %v760_v48 = vpop.xlane.xlu0 %759 }
 0x32f   : > { %1322 = vrcp.f32 %v760_v48 }
 0x339   : > { %v1323_v49 = vpop.eup %1322 }
 0x33a   : > { %v762_v50 = vmul.f32 %v1323_v49, %v1321_v44 }
 0x33c   : > { %763 = vst.msk [vmem:[%s458_s13] sm:$0xff] %vm699_vm3, %v762_v50  ;;  %v764_v51 = vpack.c.bf16 %v762_v50, %v762_v50 }
 0x33e   : > { %1202 = vmatmul.mubr.msk.bf16.vlgmr.msra.gmra.mrb[8].mxu0 %vm699_vm3, %v764_v51 }
 0x411   : > { %v806_v52 = vpop.f32.mrb[8].mxu0 }
 0x412   : > { %v812_v53 = vpack.c.bf16 %v806_v52, %v806_v52  ;;  %v1203_v54 = vpop.f32.mrb[9].mxu0 }
 0x413   : > { %v809_v55 = vpop.f32.mrb[10].mxu0 }
 0x414   : > { %v1204_v56 = vpop.f32.mrb[11].mxu0  ;;  %1208 = vmatmul.mubr.msk.bf16.vlgmr.msra.gmra.mrb[8].mxu1 %vm699_vm3, %v812_v53 }
 0x4e4   : > { %863 = sbr.rel (%p1141_p11) target bundleno = 1259 (0x4eb), region = 60 }
 0x4e7   : > { %v854_v57 = vpop.f32.mrb[8].mxu1 }
 0x4e8   : > { %v1209_v58 = vpop.f32.mrb[9].mxu1  ;;  %v871_v62 = vadd.f32 (!%p1141_p11), %v1142_v61, %v854_v57 }
 0x4e9   : > { %v857_v59 = vpop.f32.mrb[10].mxu1 }
 0x4ea   : > { %v1210_v60 = vpop.f32.mrb[11].mxu1  ;;  %872 = vst.msk [vmem:[%s451_s19] sm:$0xff] (!%p1141_p11), %vm518_vm1, %v871_v62 }
 0x4eb PF: > { %p1143_p13 = scmp.le.s32.totalorder %s1472_s23, 0 }
 0x4ed   : > { %876 = sbr.rel (%p1143_p13) target bundleno = 1269 (0x4f5), region = 64 }
 0x4f1   : > { %v877_v63 = vld [vmem:[%s451_s19] sm:$0xff] (!%p1143_p13) }
 0x4f2   : > { %v878_v0 = vadd.f32 (!%p1143_p13), %v877_v63, %v854_v57 }
 0x4f4   : > { %879 = vst.msk [vmem:[%s451_s19] sm:$0xff] %vm518_vm1, %v878_v0 }
 0x4f5 PF: > { %s1146_s12 = sshll.u32 %s1476_s24, 7  ;;  %s1899_s28 = sld [smem:[#allocation25_spill]] }
 0x4f6   : > { %s900_s20 = sshll.u32 %s451_s19, 4  ;;  %s1900_s15 = sand.u32 1, %s1464_s21   ;;  %s901_s20 = int_to_ptr.vmem [resolvable:$true] %s900_s20 }
 0x4f7   : > { %s881_s16 = scalar_lea.sflag [#allocation7], %s1900_s15  ;;  %s1336_s29 = scalar_lea.vmem %s901_s20, 128 }
 0x4f8   : > { %p1337_p0 = scmp.ne.s32.totalorder %s901_s20, %s1336_s29  ;;  %s1493_s17 = smov [#allocation6]  }
 0x4f9   : > { %s1340_s9 = sshll.u32 %s1493_s17, 4  ;;  %s1341_s9 = int_to_ptr.vmem [resolvable:$false] %s1340_s9 }
 0x4fa   : > { %p1338_p1 = pnand %p1337_p0, %p1624_p8  ;;  %s1342_s18 = scalar_lea.vmem %s1341_s9, 256 }
 0x4fb   : > { %s1767_s11 = scalar_lea.hbm %s1899_s28, %s1146_s12  ;;  %p1343_p5 = scmp.lt.s32.totalorder %s901_s20, %s1341_s9 }
 0x4fc   : > { %p1339_p2 = pneg %p1338_p1  ;;  %p1344_p6 = scmp.lt.s32.totalorder %s1342_s18, %s1336_s29 }
 0x4fe   : > { %p1345_p9 = por %p1344_p6, %p1343_p5 }
 0x500   : > { %p1346_p7 = pnand %p1345_p9, %p1339_p2 }
 0x502   : > { %1349 = shalt.err (!%p1346_p7)
}
 0x503   : > { %s1350_s19 = scalar_lea.hbm %s1767_s11, 128  ;;  %s1354_s25 = scalar_lea.hbm %s1899_s28, 256 }
 0x504   : > { %p1351_p10 = scmp.ne.s32.totalorder %s1767_s11, %s1350_s19  ;;  %p1355_p0 = scmp.lt.u32.totalorder %s1767_s11, %s1899_s28 }
 0x505   : > { %p1356_p1 = scmp.lt.u32.totalorder %s1354_s25, %s1350_s19  ;;  %p1358_p5 = scmp.lt.u32.totalorder %s1350_s19, %s1767_s11 }
 0x506   : > { %p1352_p11 = pnand %p1351_p10, %p1624_p8 }
 0x507   : > { %p1357_p2 = por %p1356_p1, %p1355_p0 }
 0x508   : > { %p1353_p13 = pneg %p1352_p11 }
 0x509   : > { %p1359_p6 = por %p1358_p5, %p1357_p2 }
 0x50b   : > { %p1360_p9 = pnand %p1359_p6, %p1353_p13 }
 0x50d   : > { %1363 = shalt.err (!%p1360_p9)
}
 0x50e   : > { %1211 = dma.vmem_to_hbm [thread:$0]  (%p1624_p8), %s901_s20, 128, %s1767_s11, %s881_s16  }
 0x50f   : > { %s1147_s29 = sshll.u32 %s1476_s24, 2  ;;  %s916_s9 = sshll.u32 %s458_s13, 4  ;;  %s1792_s9 = int_to_ptr.vmem [resolvable:$true] %s916_s9 }
 0x510   : > { %s912_s18 = sadd.s32 %s1472_s23, %s1147_s29  ;;  %s1901_s14 = sld [smem:[#allocation26_spill]] }
 0x511   : > { %s1148_s19 = sshll.u32 %s912_s18, 7  ;;  %s886_s15 = scalar_lea.sflag [#allocation9], %s456_s26 }
 0x512   : > { %s1364_s17 = scalar_lea.vmem %s1792_s9, 128  ;;  %s1494_s24 = smov [#allocation8]  }
 0x513   : > { %p1365_p7 = scmp.ne.s32.totalorder %s1792_s9, %s1364_s17  ;;  %s1368_s30 = sshll.u32 %s1494_s24, 4  ;;  %s1369_s30 = int_to_ptr.vmem [resolvable:$false] %s1368_s30 }
 0x514   : > { %s1370_s23 = scalar_lea.vmem %s1369_s30, 256  ;;  %p1371_p11 = scmp.lt.s32.totalorder %s1792_s9, %s1369_s30 }
 0x515   : > { %p1366_p8 = pnand %p1365_p7, %p1653_p3  ;;  %p1372_p13 = scmp.lt.s32.totalorder %s1370_s23, %s1364_s17 }
 0x516   : > { %s914_s25 = scalar_lea.hbm %s1901_s14, %s1148_s19 }
 0x517   : > { %p1367_p10 = pneg %p1366_p8  ;;  %p1373_p0 = por %p1372_p13, %p1371_p11 }
 0x519   : > { %p1374_p1 = pnand %p1373_p0, %p1367_p10 }
 0x51b   : > { %1377 = shalt.err (!%p1374_p1)
}
 0x51c   : > { %s1378_s13 = scalar_lea.hbm %s914_s25, 128  ;;  %s1382_s20 = scalar_lea.hbm %s1901_s14, 1024 }
 0x51d   : > { %p1379_p2 = scmp.ne.s32.totalorder %s914_s25, %s1378_s13  ;;  %p1383_p9 = scmp.lt.u32.totalorder %s914_s25, %s1901_s14 }
 0x51e   : > { %p1384_p7 = scmp.lt.u32.totalorder %s1382_s20, %s1378_s13  ;;  %p1386_p4 = scmp.lt.u32.totalorder %s1378_s13, %s914_s25 }
 0x51f   : > { %p1380_p5 = pnand %p1379_p2, %p1653_p3 }
 0x520   : > { %p1385_p8 = por %p1384_p7, %p1383_p9 }
 0x521   : > { %p1381_p6 = pneg %p1380_p5 }
 0x522   : > { %p1387_p11 = por %p1386_p4, %p1385_p8 }
 0x524   : > { %p1388_p10 = pnand %p1387_p11, %p1381_p6 }
 0x526   : > { %1391 = shalt.err (!%p1388_p10)
}
 0x527   : > { %1212 = dma.vmem_to_hbm [thread:$0]  (%p1653_p3), %s1792_s9, 128, %s914_s25, %s886_s15  }
 0x528 PF: > { %s1902_s18 = sld [smem:[#allocation15_spill]]  ;;  %p1222_p13 = scmp.ge.s32.totalorder %s1488_s27, 2 }
 0x52a   : > { %p1216_p0 = pnand %p1222_p13, %p1641_p12 }
 0x52e   : > { %s928_s12 = sand.u32 1, %s1902_s18  }
 0x52f   : > { %s929_s22 = scalar_lea.sflag [#allocation7], %s928_s12 }
 0x530   : > { %1439 = dma.done.wait (!%p1216_p0), %s929_s22, 128  }
 0x531   : > { %1441 = vsyncadd (!%p1216_p0), %s929_s22, 4294967168  ;;  %s1904_s17 = sld [smem:[#allocation13_spill]]  ;;  %s1905_s24 = sld [smem:[#allocation24_spill]] }
 0x537   : > { %s937_s30 = sand.u32 1, %s1904_s17   ;;  %p1906_p4 = scmp.ne.s32.totalorder %s1905_s24, 0 }
 0x538   : > { %s938_s23 = scalar_lea.sflag [#allocation9], %s937_s30 }
 0x539   : > { %p1219_p1 = pnand %p1222_p13, %p1906_p4 }
 0x53b   : > { %1443 = dma.done.wait (!%p1219_p1), %s938_s23, 128  }
 0x53c   : > { %1445 = vsyncadd (!%p1219_p1), %s938_s23, 4294967168  ;;  %s33_s27 = sadd.s32 1, %s1488_s27   ;;  %s1907_s10 = sld [smem:[#allocation14_spill]] }
 0x53d   : > { %p30_p3 = scmp.ge.s32.totalorder %s33_s27, 10   ;;  %s1908_s19 = sld [smem:[#allocation23_spill]] }
 0x53e   : > { %s1909_s9 = sld [smem:[#allocation16_spill]]  ;;  %s1910_s22 = sld [smem:[#allocation22_spill]] }
 0x53f   : > { %s1911_s23 = sld [smem:[#allocation17_spill]]  ;;  %s1912_s24 = sld [smem:[#allocation18_spill]] }
 0x540   : > { %s1913_s25 = sld [smem:[#allocation19_spill]]  ;;  %s1914_s26 = sld [smem:[#allocation20_spill]] }
 0x541   : > { %s1915_s18 = smov %s1452_s0  ;;  %s1917_s20 = smov %s1464_s21 }
 0x542   : > { %s1916_s0 = smov %s1907_s10  ;;  %32 = sbr.rel (!%p30_p3) target bundleno = 25 (0x19), region = 138 }
 0x544   : > { %s1918_s21 = smov %s1909_s9 }
 0x549   :  { %943 = vsyncpa [#allocation7], 1 }
 0x54a   :  { %945 = vsyncpa [#allocation7 + $0x1], 1 }
 0x54b   :  { %946 = vsyncpa [#allocation9], 1 }
 0x54c   :  { %948 = vsyncpa [#allocation9 + $0x1], 1 }

</bundles_post_ra>
